<compile_context>
chip_gen: v5e
topology: v5e:2x2
jax: 0.10.0
libtpu: 0.0.40
codegen_flags: <defaults>
</compile_context>

<pallas_src>
import functools

import jax
import jax.numpy as jnp
from jax.experimental import pallas as pl
from jax.experimental.pallas import tpu as pltpu

LANE = 128
SUBLANE = 8
DEFAULT_BLOCK_ROWS = 2048   # (2048, 128) f32 block = 1 MiB; double-buffered = 2 MiB VMEM
NCORES = 2                  # split the reduction across 2 TCs (v7x); no-op on 1-TC chips


def _clearance_kernel(x_ref, sum_ref, cnt_ref, pen_acc, cnt_acc, *,
                      beta, thresh, rows, block_rows, steps_per_core, needs_row_mask):
    """Process one (block_rows, LANE) tile; accumulate penalty/count into VMEM vregs."""
    c = pl.program_id(0)   # "core" (parallel) axis
    i = pl.program_id(1)   # reduction axis

    @pl.when(i == 0)
    def _():
        pen_acc[...] = jnp.zeros_like(pen_acc)
        cnt_acc[...] = jnp.zeros_like(cnt_acc)

    x = x_ref[...].astype(jnp.float32)            # (block_rows, LANE); cast in-kernel
    mask = x < thresh
    if needs_row_mask:
        # Last grid block may be partial (or a clamped duplicate); mask rows >= rows.
        logical_block = c * steps_per_core + i
        row_idx = logical_block * block_rows + jax.lax.broadcasted_iota(
            jnp.int32, (block_rows, LANE), 0)
        mask = jnp.logical_and(row_idx < rows, mask)

    # TODO(synk): on v7x the single EUP slot (exp over every element) may become the
    # bottleneck once HBM is no longer limiting; could gate exp with @pl.when(any(mask)).
    pen = jnp.where(mask, jnp.exp(-beta * (x - thresh)), 0.0)
    cnt = mask.astype(jnp.float32)

    if block_rows % SUBLANE == 0:
        # Pure-VPU vreg adds: fold the block onto the (8, 128) accumulators.
        pen_acc[...] += pen.reshape(block_rows // SUBLANE, SUBLANE, LANE).sum(axis=0)
        cnt_acc[...] += cnt.reshape(block_rows // SUBLANE, SUBLANE, LANE).sum(axis=0)
    else:
        # Tiny single-block fallback (rows not a sublane multiple); perf-irrelevant.
        pen_acc[0:1, :] = pen_acc[0:1, :] + jnp.sum(pen, axis=0, keepdims=True)
        cnt_acc[0:1, :] = cnt_acc[0:1, :] + jnp.sum(cnt, axis=0, keepdims=True)

    @pl.when(i == pl.num_programs(1) - 1)
    def _():
        sum_ref[...] = pen_acc[...]
        cnt_ref[...] = cnt_acc[...]


def clearance_penalty_sdf(near_sdf: jax.Array, *, beta: float = 1.0, thresh: float = 0.01,
                          max_block_rows: int = DEFAULT_BLOCK_ROWS):
    """Pallas equivalent of ClearanceLoss.fn_penalty_sdf. Returns (num_pen_pts, penalty)."""
    n = near_sdf.size
    flat = jnp.reshape(near_sdf, (-1,))            # native dtype; no wrapper astype

    rem = n % LANE
    if rem != 0:
        # TODO(synk): this <=127-element pad still costs one full-array XLA copy; could be
        # avoided by reducing the <128-element tail in pure JAX if it ever matters.
        flat = jnp.pad(flat, (0, LANE - rem), constant_values=float(thresh) + 1.0)
    rows = flat.shape[0] // LANE
    x2d = flat.reshape(rows, LANE)                 # layout-preserving reshape (no copy)

    if rows <= max_block_rows:
        block_rows = rows                          # single block == full row extent (legal)
    else:
        block_rows = max(SUBLANE, (max_block_rows // SUBLANE) * SUBLANE)

    num_blocks = pl.cdiv(rows, block_rows)
    ncores = min(NCORES, num_blocks)
    steps_per_core = pl.cdiv(num_blocks, ncores)
    needs_row_mask = (rows % block_rows != 0) or (ncores * steps_per_core != num_blocks)

    def x_index_map(c, i):
        blk = c * steps_per_core + i
        # Clamp out-of-range duplicate blocks; their rows are masked out in-kernel.
        return (jnp.minimum(blk, num_blocks - 1), 0)

    kernel = functools.partial(
        _clearance_kernel, beta=float(beta), thresh=float(thresh), rows=rows,
        block_rows=block_rows, steps_per_core=steps_per_core, needs_row_mask=needs_row_mask)

    sum_out, cnt_out = pl.pallas_call(
        kernel,
        out_shape=(
            jax.ShapeDtypeStruct((ncores * SUBLANE, LANE), jnp.float32),
            jax.ShapeDtypeStruct((ncores * SUBLANE, LANE), jnp.float32),
        ),
        grid_spec=pltpu.PrefetchScalarGridSpec(
            num_scalar_prefetch=0,
            grid=(ncores, steps_per_core),
            in_specs=[pl.BlockSpec((block_rows, LANE), x_index_map)],
            out_specs=(
                pl.BlockSpec((SUBLANE, LANE), lambda c, i: (c, 0)),
                pl.BlockSpec((SUBLANE, LANE), lambda c, i: (c, 0)),
            ),
            scratch_shapes=[pltpu.VMEM((SUBLANE, LANE), jnp.float32),
                            pltpu.VMEM((SUBLANE, LANE), jnp.float32)],
        ),
        compiler_params=pltpu.CompilerParams(
            dimension_semantics=("parallel", "arbitrary"),
        ),
    )(x2d)

    # Tiny final reductions over (ncores*8, 128) partial sums happen in plain XLA.
    num_pen_pts = jnp.sum(cnt_out.astype(jnp.int32))
    penalty = jnp.where(num_pen_pts > 0,
                        jnp.sum(sum_out) / jnp.float32(n),
                        jnp.float32(0.0))
    return num_pen_pts, penalty


class ClearanceLoss:
    """JAX/Pallas re-implementation of the per-class clearance regularizer."""

    def __init__(self, class_name_cfgs, drawable_class_names):
        if isinstance(class_name_cfgs, (int, float)):
            class_name_cfgs = {cn: {"w": float(class_name_cfgs)} for cn in drawable_class_names}
        else:
            class_name_cfgs = {
                k: ({"w": float(v)} if isinstance(v, (int, float)) else dict(v))
                for k, v in class_name_cfgs.items()
            }
        self.class_name_cfgs = class_name_cfgs

    def __call__(self, per_class_near_sdf):
        """per_class_near_sdf: dict class_name -> near_sdf array (any shape)."""
        # TODO(synk): optional 'anneal' weight schedule (get_anneal_val) not implemented.
        # TODO(synk): tiny per-class tensors could be fused into one pallas_call to amortize
        #             launch cost; kept per-class for clarity.
        ret_losses = {}
        for class_name, near_sdf in per_class_near_sdf.items():
            if class_name not in self.class_name_cfgs:
                continue
            cfg = dict(self.class_name_cfgs[class_name])
            w = cfg.pop("w", None)
            cfg.pop("anneal", None)
            assert w is not None
            _, penalty = clearance_penalty_sdf(
                near_sdf, beta=cfg.get("beta", 1.0), thresh=cfg.get("thresh", 0.01)
            )
            ret_losses[f"loss_clearance.{class_name}"] = jnp.float32(w) * penalty
        return ret_losses


if __name__ == "__main__":
    key = jax.random.PRNGKey(0)
    k1, k2, k3 = jax.random.split(key, 3)

    # Class "Street": 2*4*16*16 = 2048 pts (multiple of 128 -> zero-copy, single-block path).
    street_sdf = 0.05 * jax.random.normal(k1, (2, 4, 16, 16), dtype=jnp.float32)
    # Class "Obj": ragged 300 pts -> exercises the lane-pad + tiny-block fallback path.
    obj_sdf = 0.05 * jax.random.normal(k2, (3, 100), dtype=jnp.float32)

    loss_mod = ClearanceLoss(
        class_name_cfgs={
            "Street": {"w": 1.0, "thresh": 0.01, "beta": 10.0},
            "Obj": {"w": 0.5, "thresh": 0.01, "beta": 10.0},
        },
        drawable_class_names=["Street", "Obj"],
    )
    losses = loss_mod({"Street": street_sdf, "Obj": obj_sdf})
    jax.block_until_ready(losses)

    def ref_penalty(x, beta, thresh):
        m = x < thresh
        return jnp.where(
            m.sum() > 0,
            jnp.sum(jnp.where(m, jnp.exp(-beta * (x - thresh)), 0.0)) / x.size,
            0.0,
        )

    ref_street = 1.0 * ref_penalty(street_sdf, 10.0, 0.01)
    ref_obj = 0.5 * ref_penalty(obj_sdf, 10.0, 0.01)
    assert jnp.allclose(losses["loss_clearance.Street"], ref_street, rtol=1e-5, atol=1e-6), (
        losses["loss_clearance.Street"], ref_street)
    assert jnp.allclose(losses["loss_clearance.Obj"], ref_obj, rtol=1e-5, atol=1e-6), (
        losses["loss_clearance.Obj"], ref_obj)

    # Exercise the multi-block + 2-core split + row-mask + clamped-block path at small scale.
    big_sdf = 0.05 * jax.random.normal(k3, (4281,), dtype=jnp.float32)
    cnt, pen = clearance_penalty_sdf(big_sdf, beta=5.0, thresh=0.02, max_block_rows=8)
    jax.block_until_ready(pen)
    m = big_sdf < 0.02
    ref_pen = jnp.where(
        m.sum() > 0,
        jnp.sum(jnp.where(m, jnp.exp(-5.0 * (big_sdf - 0.02)), 0.0)) / big_sdf.size,
        0.0,
    )
    assert jnp.allclose(pen, ref_pen, rtol=1e-5, atol=1e-6), (pen, ref_pen)
    assert int(cnt) == int(m.sum()), (int(cnt), int(m.sum()))

    print("KERNEL_OK")
</pallas_src>

<mosaic_0001>
module attributes {stable_mosaic.version = 11 : i64} {
  func.func @_clearance_kernel(%arg0: i32, %arg1: i32, %arg2: memref<16x128xf32, #tpu.memory_space<vmem>>, %arg3: memref<8x128xf32, #tpu.memory_space<vmem>>, %arg4: memref<8x128xf32, #tpu.memory_space<vmem>>, %arg5: memref<8x128xf32, #tpu.memory_space<vmem>>, %arg6: memref<8x128xf32, #tpu.memory_space<vmem>>) attributes {dimension_semantics = [#tpu.dimension_semantics<parallel>, #tpu.dimension_semantics<arbitrary>], iteration_bounds = array<i64: 1, 1>, scalar_prefetch = 0 : i64, scratch_operands = 2 : i64, tpu.core_type = #tpu.core_type<tc>, window_params = [{transform_indices = @transform_0, window_bounds = array<i64: 16, 128>}, {transform_indices = @transform_1, window_bounds = array<i64: 8, 128>}, {transform_indices = @transform_2, window_bounds = array<i64: 8, 128>}]} {
    %c0_i32 = arith.constant 0 : i32
    %0 = arith.cmpi eq, %arg1, %c0_i32 : i32
    %1 = arith.extui %0 : i1 to i32
    %c0_i32_0 = arith.constant 0 : i32
    %2 = arith.cmpi ne, %1, %c0_i32_0 : i32
    scf.if %2 {
      %cst_17 = arith.constant 0.000000e+00 : f32
      %28 = vector.broadcast %cst_17 : f32 to vector<8x128xf32>
      %c0_18 = arith.constant 0 : index
      %c0_19 = arith.constant 0 : index
      %29 = vector.load %arg5[%c0_18, %c0_19] : memref<8x128xf32, #tpu.memory_space<vmem>>, vector<8x128xf32>
      tpu.vector_store %arg5[%c0_18, %c0_19], %28 {strides = array<i32>} : memref<8x128xf32, #tpu.memory_space<vmem>>, vector<8x128xf32>,
      %cst_20 = arith.constant 0.000000e+00 : f32
      %30 = vector.broadcast %cst_20 : f32 to vector<8x128xf32>
      %c0_21 = arith.constant 0 : index
      %c0_22 = arith.constant 0 : index
      %31 = vector.load %arg6[%c0_21, %c0_22] : memref<8x128xf32, #tpu.memory_space<vmem>>, vector<8x128xf32>
      tpu.vector_store %arg6[%c0_21, %c0_22], %30 {strides = array<i32>} : memref<8x128xf32, #tpu.memory_space<vmem>>, vector<8x128xf32>,
    } else {
    }
    %c0 = arith.constant 0 : index
    %c0_1 = arith.constant 0 : index
    %3 = vector.load %arg2[%c0, %c0_1] : memref<16x128xf32, #tpu.memory_space<vmem>>, vector<16x128xf32>
    %cst = arith.constant 0.00999999977 : f32
    %4 = vector.broadcast %cst : f32 to vector<16x128xf32>
    %5 = arith.cmpf olt, %3, %4 : vector<16x128xf32>
    %cst_2 = arith.constant 0.00999999977 : f32
    %6 = vector.broadcast %cst_2 : f32 to vector<16x128xf32>
    %7 = arith.subf %3, %6 : vector<16x128xf32>
    %cst_3 = arith.constant -1.000000e+01 : f32
    %8 = vector.broadcast %cst_3 : f32 to vector<16x128xf32>
    %9 = arith.mulf %8, %7 : vector<16x128xf32>
    %10 = math.exp %9 : vector<16x128xf32>
    %cst_4 = arith.constant 0.000000e+00 : f32
    %11 = vector.broadcast %cst_4 : f32 to vector<16x128xf32>
    %12 = arith.select %5, %10, %11 : vector<16x128xi1>, vector<16x128xf32>
    %13 = arith.extui %5 : vector<16x128xi1> to vector<16x128xi32>
    %14 = arith.sitofp %13 : vector<16x128xi32> to vector<16x128xf32>
    %c0_5 = arith.constant 0 : index
    %c0_6 = arith.constant 0 : index
    %15 = vector.load %arg5[%c0_5, %c0_6] : memref<8x128xf32, #tpu.memory_space<vmem>>, vector<8x128xf32>
    %16 = vector.shape_cast %12 : vector<16x128xf32> to vector<2x8x128xf32>
    %cst_7 = arith.constant dense<0.000000e+00> : vector<8x128xf32>
    %17 = vector.multi_reduction <add>, %16, %cst_7 [0] : vector<2x8x128xf32> to vector<8x128xf32>
    %18 = arith.addf %15, %17 : vector<8x128xf32>
    %c0_8 = arith.constant 0 : index
    %c0_9 = arith.constant 0 : index
    %19 = vector.load %arg5[%c0_8, %c0_9] : memref<8x128xf32, #tpu.memory_space<vmem>>, vector<8x128xf32>
    tpu.vector_store %arg5[%c0_8, %c0_9], %18 {strides = array<i32>} : memref<8x128xf32, #tpu.memory_space<vmem>>, vector<8x128xf32>,
    %c0_10 = arith.constant 0 : index
    %c0_11 = arith.constant 0 : index
    %20 = vector.load %arg6[%c0_10, %c0_11] : memref<8x128xf32, #tpu.memory_space<vmem>>, vector<8x128xf32>
    %21 = vector.shape_cast %14 : vector<16x128xf32> to vector<2x8x128xf32>
    %cst_12 = arith.constant dense<0.000000e+00> : vector<8x128xf32>
    %22 = vector.multi_reduction <add>, %21, %cst_12 [0] : vector<2x8x128xf32> to vector<8x128xf32>
    %23 = arith.addf %20, %22 : vector<8x128xf32>
    %c0_13 = arith.constant 0 : index
    %c0_14 = arith.constant 0 : index
    %24 = vector.load %arg6[%c0_13, %c0_14] : memref<8x128xf32, #tpu.memory_space<vmem>>, vector<8x128xf32>
    tpu.vector_store %arg6[%c0_13, %c0_14], %23 {strides = array<i32>} : memref<8x128xf32, #tpu.memory_space<vmem>>, vector<8x128xf32>,
    %c0_i32_15 = arith.constant 0 : i32
    %25 = arith.cmpi eq, %arg1, %c0_i32_15 : i32
    %26 = arith.extui %25 : i1 to i32
    %c0_i32_16 = arith.constant 0 : i32
    %27 = arith.cmpi ne, %26, %c0_i32_16 : i32
    scf.if %27 {
      %c0_17 = arith.constant 0 : index
      %c0_18 = arith.constant 0 : index
      %28 = vector.load %arg5[%c0_17, %c0_18] : memref<8x128xf32, #tpu.memory_space<vmem>>, vector<8x128xf32>
      %c0_19 = arith.constant 0 : index
      %c0_20 = arith.constant 0 : index
      %29 = vector.load %arg3[%c0_19, %c0_20] : memref<8x128xf32, #tpu.memory_space<vmem>>, vector<8x128xf32>
      tpu.vector_store %arg3[%c0_19, %c0_20], %28 {strides = array<i32>} : memref<8x128xf32, #tpu.memory_space<vmem>>, vector<8x128xf32>,
      %c0_21 = arith.constant 0 : index
      %c0_22 = arith.constant 0 : index
      %30 = vector.load %arg6[%c0_21, %c0_22] : memref<8x128xf32, #tpu.memory_space<vmem>>, vector<8x128xf32>
      %c0_23 = arith.constant 0 : index
      %c0_24 = arith.constant 0 : index
      %31 = vector.load %arg4[%c0_23, %c0_24] : memref<8x128xf32, #tpu.memory_space<vmem>>, vector<8x128xf32>
      tpu.vector_store %arg4[%c0_23, %c0_24], %30 {strides = array<i32>} : memref<8x128xf32, #tpu.memory_space<vmem>>, vector<8x128xf32>,
    } else {
    }
    return
  }
  func.func @transform_0(%arg0: i32, %arg1: i32) -> (i32, i32) {
    %c1_i32 = arith.constant 1 : i32
    %0 = arith.muli %arg0, %c1_i32 : i32
    %1 = arith.addi %0, %arg1 : i32
    %c0_i32 = arith.constant 0 : i32
    %2 = arith.minsi %1, %c0_i32 : i32
    %c0_i32_0 = arith.constant 0 : i32
    %c0_i32_1 = arith.constant 0 : i32
    return %2, %c0_i32_0 : i32, i32
  }
  func.func @transform_1(%arg0: i32, %arg1: i32) -> (i32, i32) {
    %c0_i32 = arith.constant 0 : i32
    %c0_i32_0 = arith.constant 0 : i32
    return %arg0, %c0_i32 : i32, i32
  }
  func.func @transform_2(%arg0: i32, %arg1: i32) -> (i32, i32) {
    %c0_i32 = arith.constant 0 : i32
    %c0_i32_0 = arith.constant 0 : i32
    return %arg0, %c0_i32 : i32, i32
  }
}

</mosaic_0001>

<bundles_post_ra>
// kernel: tpu_custom_call.1
= control target key start
LH: loop header
LB: loop body
LE: loop exit
PB: predicated region body
PF: predicated region fallthrough
CT: control target
= control target key end

     0   :  { %8 = vsyncpa [#allocation5], 0  ;;  %s238_s0 = inlined_call_operand.hbm [shape: f32[16,128], index: 0, kind: input, shape index: {}]   ;;  %s239_s1 = inlined_call_operand.hbm [shape: f32[8,128], index: 1, kind: output, shape index: {0}]   ;;  %s240_s2 = inlined_call_operand.hbm [shape: f32[8,128], index: 2, kind: output, shape index: {1}]  }
   0x1   :  { %9 = vsyncpa [#allocation6], 0 }
   0x2   :  { %10 = vsyncpa [#allocation9], 0  ;;  %s21_s11 = sshll.u32 %s238_s0, 4  ;;  %s204_s12 = smov [#allocation4]   ;;  %s22_s11 = int_to_ptr.hbm [resolvable:$true] %s21_s11 }
   0x3   :  { %s23_s13 = sshll.u32 %s204_s12, 4  ;;  %s205_s14 = smov 128   ;;  %s24_s13 = int_to_ptr.vmem [resolvable:$true] %s23_s13 }
   0x4   :  { %s206_s15 = smov 8  }
   0x5   :  { %29 = dma.hbm_to_vmem [thread:$0]  %s22_s11, 256, %s24_s13, [#allocation5], %s205_s14, %s205_s14, %s206_s15  }
   0x6   :  { %198 = dma.done.wait [#allocation5], 256  }
   0x7   :  { %199 = vsyncadd [#allocation5], 4294967040  ;;  %v44_v0 = vld [vmem:[#allocation4] sm:$0xff]  ;;  %v45_v1 = vld [vmem:[#allocation4 + $0x8] sm:$0xff]  ;;  %s207_s16 = smov [#allocation8]   ;;  %s95_s20 = sshll.u32 %s240_s2, 4  ;;  %s96_s20 = int_to_ptr.hbm [resolvable:$true] %s95_s20 }
   0x8   :  { %s93_s17 = sshll.u32 %s207_s16, 4  ;;  %vm46_vm0 = vcmp.lt.f32.partialorder %v44_v0, 0.01  ;;  %vm47_vm1 = vcmp.lt.f32.partialorder %v45_v1, 0.01  ;;  %v208_v4 = vmov 0.0   ;;  %s94_s17 = int_to_ptr.vmem [resolvable:$true] %s93_s17 }
   0x9   :  { %v112_v2 = vadd.f32 -0.01, %v44_v0  ;;  %v113_v3 = vadd.f32 -0.01, %v45_v1  ;;  %v114_v5 = vsel %vm46_vm0, 1.0, %v208_v4  ;;  %v115_v6 = vsel %vm47_vm1, 1.0, %v208_v4 }
   0xa   :  { %v67_v8 = vadd.f32 %v115_v6, %v114_v5  ;;  %s209_s0 = smov [#allocation7]   ;;  %s84_s23 = sshll.u32 %s239_s1, 4  ;;  %s85_s23 = int_to_ptr.hbm [resolvable:$true] %s84_s23 }
   0xb   :  { %v50_v7 = vmul.f32 -10.0, %v112_v2  ;;  %v51_v9 = vmul.f32 -10.0, %v113_v3  ;;  %s82_s2 = sshll.u32 %s209_s0, 4  ;;  %s83_s2 = int_to_ptr.vmem [resolvable:$true] %s82_s2 }
   0xc   :  { %76 = vst [vmem:[#allocation8] sm:$0xff] %v67_v8 }
   0xd   :  { %v52_v10 = vmul.f32 1.442695, %v50_v7  ;;  %v54_v11 = vmul.f32 1.442695, %v51_v9  ;;  %98 = dma.vmem_to_hbm [thread:$0]  %s94_s17, 128, %s96_s20, [#allocation9]  }
   0xf   :  { %122 = vpow2.f32 %v52_v10 }
  0x10   :  { %124 = vpow2.f32 %v54_v11 }
  0x15   :  { %v123_v12 = vpop.eup %122 }
  0x16   :  { %v125_v13 = vpop.eup %124  ;;  %v56_v14 = vsel %vm46_vm0, %v123_v12, 0.0 }
  0x17   :  { %v57_v15 = vsel %vm47_vm1, %v125_v13, 0.0 }
  0x18   :  { %v63_v16 = vadd.f32 %v57_v15, %v56_v14 }
  0x1a   :  { %74 = vst [vmem:[#allocation7] sm:$0xff] %v63_v16 }
  0x1b   :  { %87 = dma.vmem_to_hbm [thread:$0]  %s83_s2, 128, %s85_s23, [#allocation6]  }
  0x1c   :  { %200 = dma.done.wait [#allocation6], 128  }
  0x1d   :  { %201 = vsyncadd [#allocation6], 4294967168 }
  0x1e   :  { %202 = dma.done.wait [#allocation9], 128  }
  0x1f   :  { %203 = vsyncadd [#allocation9], 4294967168 }
  0x20   :  { %107 = vsyncpa [#allocation5], 1 }
  0x21   :  { %108 = vsyncpa [#allocation6], 1 }
  0x22   :  { %109 = vsyncpa [#allocation9], 1 }

</bundles_post_ra>
